<compile_context>
chip_gen: v5e
topology: v5e:2x2
jax: 0.10.0
libtpu: 0.0.40
codegen_flags: <defaults>
</compile_context>

<pallas_src>
import functools

import jax
import jax.numpy as jnp
from jax import lax
from jax.experimental import pallas as pl
from jax.experimental.pallas import tpu as pltpu


def _round_up(n, m):
    return (n + m - 1) // m * m


def _round_down(n, m):
    return n // m * m


def mtfnn_kernel(x_ref,
                 w1_ref, b1_ref,
                 w2_ref, b2_ref,
                 w3_ref, b3_ref,
                 w4_ref, b4_ref,
                 w5_ref, b5_ref,
                 o_ref,
                 *, compute_dtype):
    # x_ref: [TB, in_dim] raw f32 batch tile (batch on sublanes).
    # All layer math runs TRANSPOSED: activations are [features, TB] with the
    # batch on the 128-lane axis, so every MXU output is lane-dense and the
    # final store is an unmasked lane-dense vst.
    xb = x_ref[...].astype(compute_dtype)                      # [TB, in_dim]

    # Layer 1: contract x's last axis -> result is already transposed [64, TB].
    y = lax.dot_general(w1_ref[...], xb,
                        dimension_numbers=(((1,), (1,)), ((), ())),
                        preferred_element_type=jnp.float32)
    y = jnp.maximum(y + b1_ref[...], 0.0)                      # [64, TB] f32

    def layer(w_ref, b_ref, h, relu=True):
        h = h.astype(compute_dtype)
        out = jnp.dot(w_ref[...], h,
                      preferred_element_type=jnp.float32) + b_ref[...]
        return jnp.maximum(out, 0.0) if relu else out

    y = layer(w2_ref, b2_ref, y)                               # [32, TB]
    y = layer(w3_ref, b3_ref, y)                               # [16, TB]
    y = layer(w4_ref, b4_ref, y)                               # [32, TB]
    y = layer(w5_ref, b5_ref, y, relu=False)                   # [out_dim, TB]

    out_dim = y.shape[0]
    if out_dim <= 2:
        # Degenerate head (softmax slice empty): everything is sigmoid.
        e = jnp.exp(jnp.minimum(-y, 80.0))
        o_ref[...] = pl.reciprocal(1.0 + e, approx=True).astype(o_ref.dtype)
        return

    # Head: rows [0:2] -> sigmoid, rows [2:] -> softmax along the feature axis
    # (axis 0 in the transposed layout).  Single exp pass: the exp argument is
    # -y on the sigmoid rows and (y - m) on the softmax rows, clamped so exp
    # never overflows (keeps the approx reciprocal NaN/inf free).  All
    # reductions are along axis 0 (per lane/column), so padded batch columns
    # never contaminate valid ones.
    row = lax.broadcasted_iota(jnp.int32, y.shape, dimension=0)
    is_sig = row < 2

    y_soft = jnp.where(is_sig, -jnp.inf, y)
    m = jnp.max(y_soft, axis=0, keepdims=True)                 # [1, TB]
    z = jnp.where(is_sig, -y, y - m)
    z = jnp.minimum(z, 80.0)                                   # overflow guard
    e = jnp.exp(z)                                             # one EUP pass

    denom_soft = jnp.sum(jnp.where(is_sig, 0.0, e), axis=0, keepdims=True)
    denom = jnp.where(is_sig, 1.0 + e, denom_soft)
    num = jnp.where(is_sig, 1.0, e)
    o_ref[...] = (num * pl.reciprocal(denom, approx=True)).astype(o_ref.dtype)


def mtfnn_forward(x, params, *, block_b=8192, compute_dtype=jnp.bfloat16):
    """x: [B, in_dim] f32.  params: w_i [out_feat, in_feat], b_i [out_feat, 1]."""
    B, in_dim = x.shape
    out_dim = params["w5"].shape[0]

    # Batch tile: multiple of 128 (lane width), large by default so the
    # ~0.35 us per-grid-step pipeline overhead amortizes; capped so padded
    # batches >= 256 still get >= 2 grid steps (v7x dual-TensorCore sharding).
    Bp = _round_up(max(B, 1), 128)
    TB = max(128, _round_down(min(block_b, Bp), 128))
    if Bp >= 256:
        TB = min(TB, _round_down(Bp // 2, 128))

    # Only tiny batches (< one lane-width) get padded; larger non-multiple
    # batches rely on Pallas boundary masking of the last (partial) block.
    if B < 128:
        x_in = jnp.pad(x, ((0, 128 - B), (0, 0)))
        B_arr = 128
    else:
        x_in = x
        B_arr = B
    grid = pl.cdiv(B_arr, TB)

    ws = [params[f"w{i}"].astype(compute_dtype) for i in range(1, 6)]
    bs = [params[f"b{i}"].astype(jnp.float32) for i in range(1, 6)]
    wb_args = tuple(v for pair in zip(ws, bs) for v in pair)

    # Weights/biases stay VMEM-resident across the batch grid.
    def resident(shape):
        return pl.BlockSpec(shape, lambda i: (0, 0))

    in_specs = [pl.BlockSpec((TB, in_dim), lambda i: (i, 0))]
    for w, b in zip(ws, bs):
        in_specs += [resident(w.shape), resident(b.shape)]

    # Explicit scoped-VMEM budget (v5e defaults to 16 MiB, too small for big
    # TB): rough per-column activation footprint * TB, with 2x margin,
    # clamped to stay under every generation's physical VMEM.
    act_bytes_per_col = (64 + 32 + 16 + 32) * (4 + 2) + out_dim * 4 * 6
    vmem_est = (TB * (act_bytes_per_col + 3 * in_dim * 4 + 2 * out_dim * 4)
                + 4 * sum(w.size * 2 + b.size * 4 for w, b in zip(ws, bs)))
    vmem_limit = int(min(max(2 * vmem_est, 32 * 1024 * 1024), 64 * 1024 * 1024))

    flops = 2 * B * (in_dim * 64 + 64 * 32 + 32 * 16 + 16 * 32 + 32 * out_dim)
    bytes_accessed = (x.size * x.dtype.itemsize
                      + B * out_dim * 4
                      + sum(w.size * w.dtype.itemsize for w in ws)
                      + sum(b.size * 4 for b in bs))

    out_t = pl.pallas_call(
        functools.partial(mtfnn_kernel, compute_dtype=compute_dtype),
        out_shape=jax.ShapeDtypeStruct((out_dim, B_arr), jnp.float32),
        grid=(grid,),
        in_specs=in_specs,
        out_specs=pl.BlockSpec((out_dim, TB), lambda i: (0, i)),
        compiler_params=pltpu.CompilerParams(
            dimension_semantics=("parallel",),
            vmem_limit_bytes=vmem_limit),
        cost_estimate=pl.CostEstimate(
            flops=flops,
            transcendentals=2 * B * out_dim,
            bytes_accessed=bytes_accessed),
    )(x_in, *wb_args)

    if B_arr != B:
        out_t = out_t[:, :B]
    # Match the PyTorch module's [B, out_dim] output layout.
    return jnp.transpose(out_t)


def init_params(key, in_dim, out_dim):
    """Deterministic synthetic params (uniform, PyTorch-Linear-style bounds).

    Weights stored in PyTorch layout [out_features, in_features]; biases as
    [out_features, 1] (column vectors for the transposed kernel layout)."""
    dims = [(in_dim, 64), (64, 32), (32, 16), (16, 32), (32, out_dim)]
    params = {}
    for i, (fan_in, fan_out) in enumerate(dims, start=1):
        key, kw, kb = jax.random.split(key, 3)
        bound = 1.0 / (fan_in ** 0.5)
        params[f"w{i}"] = jax.random.uniform(
            kw, (fan_out, fan_in), jnp.float32, -bound, bound)
        params[f"b{i}"] = jax.random.uniform(
            kb, (fan_out, 1), jnp.float32, -bound, bound)
    return params


def mtfnn_reference(x, params, compute_dtype=jnp.bfloat16):
    """Plain-JAX reference with the same bf16-input / f32-accumulate numerics."""
    h = x.astype(jnp.float32)
    for i in range(1, 6):
        w = params[f"w{i}"].astype(compute_dtype)
        b = params[f"b{i}"].astype(jnp.float32)
        y = jnp.dot(h.astype(compute_dtype), w.T,
                    preferred_element_type=jnp.float32) + b.T
        h = jnp.maximum(y, 0.0) if i < 5 else y
    sig = jax.nn.sigmoid(h[:, :2])
    soft = jax.nn.softmax(h[:, 2:], axis=-1)
    return jnp.concatenate([sig, soft], axis=-1)


if __name__ == "__main__":
    key = jax.random.PRNGKey(0)
    in_dim, out_dim, batch = 10, 5, 64

    kx, kp = jax.random.split(key)
    x = jax.random.normal(kx, (batch, in_dim), jnp.float32)
    params = init_params(kp, in_dim, out_dim)

    out = jax.block_until_ready(mtfnn_forward(x, params))

    ref = mtfnn_reference(x, params)
    assert out.shape == (batch, out_dim)
    assert jnp.allclose(out, ref, atol=2e-3, rtol=2e-3), "mismatch vs reference"

    print("KERNEL_OK")
</pallas_src>

<mosaic_0001>
module attributes {stable_mosaic.version = 11 : i64} {
  func.func @mtfnn_kernel(%arg0: i32, %arg1: memref<128x10xf32, #tpu.memory_space<vmem>>, %arg2: memref<64x10xbf16, #tpu.memory_space<vmem>>, %arg3: memref<64x1xf32, #tpu.memory_space<vmem>>, %arg4: memref<32x64xbf16, #tpu.memory_space<vmem>>, %arg5: memref<32x1xf32, #tpu.memory_space<vmem>>, %arg6: memref<16x32xbf16, #tpu.memory_space<vmem>>, %arg7: memref<16x1xf32, #tpu.memory_space<vmem>>, %arg8: memref<32x16xbf16, #tpu.memory_space<vmem>>, %arg9: memref<32x1xf32, #tpu.memory_space<vmem>>, %arg10: memref<5x32xbf16, #tpu.memory_space<vmem>>, %arg11: memref<5x1xf32, #tpu.memory_space<vmem>>, %arg12: memref<5x128xf32, #tpu.memory_space<vmem>>) attributes {dimension_semantics = [#tpu.dimension_semantics<parallel>], iteration_bounds = array<i64: 1>, scalar_prefetch = 0 : i64, scratch_operands = 0 : i64, tpu.core_type = #tpu.core_type<tc>, window_params = [{transform_indices = @transform_0, window_bounds = array<i64: 128, 10>}, {pipeline_mode = #tpu.pipeline_mode<synchronous>, transform_indices = @transform_1, window_bounds = array<i64: 64, 10>}, {pipeline_mode = #tpu.pipeline_mode<synchronous>, transform_indices = @transform_2, window_bounds = array<i64: 64, 1>}, {pipeline_mode = #tpu.pipeline_mode<synchronous>, transform_indices = @transform_3, window_bounds = array<i64: 32, 64>}, {pipeline_mode = #tpu.pipeline_mode<synchronous>, transform_indices = @transform_4, window_bounds = array<i64: 32, 1>}, {pipeline_mode = #tpu.pipeline_mode<synchronous>, transform_indices = @transform_5, window_bounds = array<i64: 16, 32>}, {pipeline_mode = #tpu.pipeline_mode<synchronous>, transform_indices = @transform_6, window_bounds = array<i64: 16, 1>}, {pipeline_mode = #tpu.pipeline_mode<synchronous>, transform_indices = @transform_7, window_bounds = array<i64: 32, 16>}, {pipeline_mode = #tpu.pipeline_mode<synchronous>, transform_indices = @transform_8, window_bounds = array<i64: 32, 1>}, {pipeline_mode = #tpu.pipeline_mode<synchronous>, transform_indices = @transform_9, window_bounds = array<i64: 5, 32>}, {pipeline_mode = #tpu.pipeline_mode<synchronous>, transform_indices = @transform_10, window_bounds = array<i64: 5, 1>}, {transform_indices = @transform_11, window_bounds = array<i64: 5, 128>}]} {
    %c0 = arith.constant 0 : index
    %c0_0 = arith.constant 0 : index
    %0 = vector.load %arg1[%c0, %c0_0] : memref<128x10xf32, #tpu.memory_space<vmem>>, vector<128x10xf32>
    %1 = arith.truncf %0 : vector<128x10xf32> to vector<128x10xbf16>
    %c0_1 = arith.constant 0 : index
    %c0_2 = arith.constant 0 : index
    %2 = vector.load %arg2[%c0_1, %c0_2] : memref<64x10xbf16, #tpu.memory_space<vmem>>, vector<64x10xbf16>
    %cst = arith.constant dense<0.000000e+00> : vector<64x128xf32>
    %3 = tpu.matmul %2, %1, %cst {dimension_numbers = #tpu.dot_dimension_numbers<[1], [1], [0], [0], [0, 0, 1, 0], [], []>} : vector<64x10xbf16>, vector<128x10xbf16>, vector<64x128xf32> -> vector<64x128xf32>
    %c0_3 = arith.constant 0 : index
    %c0_4 = arith.constant 0 : index
    %4 = vector.load %arg3[%c0_3, %c0_4] : memref<64x1xf32, #tpu.memory_space<vmem>>, vector<64x1xf32>
    %5 = vector.broadcast %4 : vector<64x1xf32> to vector<64x128xf32>
    %6 = arith.addf %3, %5 : vector<64x128xf32>
    %cst_5 = arith.constant 0.000000e+00 : f32
    %7 = vector.broadcast %cst_5 : f32 to vector<64x128xf32>
    %8 = arith.maximumf %6, %7 : vector<64x128xf32>
    %9 = arith.truncf %8 : vector<64x128xf32> to vector<64x128xbf16>
    %c0_6 = arith.constant 0 : index
    %c0_7 = arith.constant 0 : index
    %10 = vector.load %arg4[%c0_6, %c0_7] : memref<32x64xbf16, #tpu.memory_space<vmem>>, vector<32x64xbf16>
    %cst_8 = arith.constant dense<0.000000e+00> : vector<32x128xf32>
    %11 = tpu.matmul %10, %9, %cst_8 {dimension_numbers = #tpu.dot_dimension_numbers<[1], [0], [0], [1], [0, 0, 1, 1], [], []>} : vector<32x64xbf16>, vector<64x128xbf16>, vector<32x128xf32> -> vector<32x128xf32>
    %c0_9 = arith.constant 0 : index
    %c0_10 = arith.constant 0 : index
    %12 = vector.load %arg5[%c0_9, %c0_10] : memref<32x1xf32, #tpu.memory_space<vmem>>, vector<32x1xf32>
    %13 = vector.broadcast %12 : vector<32x1xf32> to vector<32x128xf32>
    %14 = arith.addf %11, %13 : vector<32x128xf32>
    %cst_11 = arith.constant 0.000000e+00 : f32
    %15 = vector.broadcast %cst_11 : f32 to vector<32x128xf32>
    %16 = arith.maximumf %14, %15 : vector<32x128xf32>
    %17 = arith.truncf %16 : vector<32x128xf32> to vector<32x128xbf16>
    %c0_12 = arith.constant 0 : index
    %c0_13 = arith.constant 0 : index
    %18 = vector.load %arg6[%c0_12, %c0_13] : memref<16x32xbf16, #tpu.memory_space<vmem>>, vector<16x32xbf16>
    %cst_14 = arith.constant dense<0.000000e+00> : vector<16x128xf32>
    %19 = tpu.matmul %18, %17, %cst_14 {dimension_numbers = #tpu.dot_dimension_numbers<[1], [0], [0], [1], [0, 0, 1, 1], [], []>} : vector<16x32xbf16>, vector<32x128xbf16>, vector<16x128xf32> -> vector<16x128xf32>
    %c0_15 = arith.constant 0 : index
    %c0_16 = arith.constant 0 : index
    %20 = vector.load %arg7[%c0_15, %c0_16] : memref<16x1xf32, #tpu.memory_space<vmem>>, vector<16x1xf32>
    %21 = vector.broadcast %20 : vector<16x1xf32> to vector<16x128xf32>
    %22 = arith.addf %19, %21 : vector<16x128xf32>
    %cst_17 = arith.constant 0.000000e+00 : f32
    %23 = vector.broadcast %cst_17 : f32 to vector<16x128xf32>
    %24 = arith.maximumf %22, %23 : vector<16x128xf32>
    %25 = arith.truncf %24 : vector<16x128xf32> to vector<16x128xbf16>
    %c0_18 = arith.constant 0 : index
    %c0_19 = arith.constant 0 : index
    %26 = vector.load %arg8[%c0_18, %c0_19] : memref<32x16xbf16, #tpu.memory_space<vmem>>, vector<32x16xbf16>
    %cst_20 = arith.constant dense<0.000000e+00> : vector<32x128xf32>
    %27 = tpu.matmul %26, %25, %cst_20 {dimension_numbers = #tpu.dot_dimension_numbers<[1], [0], [0], [1], [0, 0, 1, 1], [], []>} : vector<32x16xbf16>, vector<16x128xbf16>, vector<32x128xf32> -> vector<32x128xf32>
    %c0_21 = arith.constant 0 : index
    %c0_22 = arith.constant 0 : index
    %28 = vector.load %arg9[%c0_21, %c0_22] : memref<32x1xf32, #tpu.memory_space<vmem>>, vector<32x1xf32>
    %29 = vector.broadcast %28 : vector<32x1xf32> to vector<32x128xf32>
    %30 = arith.addf %27, %29 : vector<32x128xf32>
    %cst_23 = arith.constant 0.000000e+00 : f32
    %31 = vector.broadcast %cst_23 : f32 to vector<32x128xf32>
    %32 = arith.maximumf %30, %31 : vector<32x128xf32>
    %33 = arith.truncf %32 : vector<32x128xf32> to vector<32x128xbf16>
    %c0_24 = arith.constant 0 : index
    %c0_25 = arith.constant 0 : index
    %34 = vector.load %arg10[%c0_24, %c0_25] : memref<5x32xbf16, #tpu.memory_space<vmem>>, vector<5x32xbf16>
    %cst_26 = arith.constant dense<0.000000e+00> : vector<5x128xf32>
    %35 = tpu.matmul %34, %33, %cst_26 {dimension_numbers = #tpu.dot_dimension_numbers<[1], [0], [0], [1], [0, 0, 1, 1], [], []>} : vector<5x32xbf16>, vector<32x128xbf16>, vector<5x128xf32> -> vector<5x128xf32>
    %c0_27 = arith.constant 0 : index
    %c0_28 = arith.constant 0 : index
    %36 = vector.load %arg11[%c0_27, %c0_28] : memref<5x1xf32, #tpu.memory_space<vmem>>, vector<5x1xf32>
    %37 = vector.broadcast %36 : vector<5x1xf32> to vector<5x128xf32>
    %38 = arith.addf %35, %37 : vector<5x128xf32>
    %39 = tpu.iota {dimensions = array<i32: 0>} : vector<5x128xi32>
    %c2_i32 = arith.constant 2 : i32
    %40 = vector.broadcast %c2_i32 : i32 to vector<5x128xi32>
    %41 = arith.cmpi slt, %39, %40 : vector<5x128xi32>
    %cst_29 = arith.constant 0xFF800000 : f32
    %42 = vector.broadcast %cst_29 : f32 to vector<5x128xf32>
    %43 = arith.select %41, %42, %38 : vector<5x128xi1>, vector<5x128xf32>
    %cst_30 = arith.constant dense<0xFF800000> : vector<128xf32>
    %44 = vector.multi_reduction <maximumf>, %43, %cst_30 [0] : vector<5x128xf32> to vector<128xf32>
    %45 = vector.shape_cast %44 : vector<128xf32> to vector<1x128xf32>
    %cst_31 = arith.constant 0.000000e+00 : f32
    %46 = vector.broadcast %cst_31 : f32 to vector<5x128xf32>
    %47 = arith.subf %46, %38 : vector<5x128xf32>
    %48 = vector.broadcast %45 : vector<1x128xf32> to vector<5x128xf32>
    %49 = arith.subf %38, %48 : vector<5x128xf32>
    %50 = arith.select %41, %47, %49 : vector<5x128xi1>, vector<5x128xf32>
    %cst_32 = arith.constant 8.000000e+01 : f32
    %51 = vector.broadcast %cst_32 : f32 to vector<5x128xf32>
    %52 = arith.minimumf %50, %51 : vector<5x128xf32>
    %53 = math.exp %52 : vector<5x128xf32>
    %cst_33 = arith.constant 0.000000e+00 : f32
    %54 = vector.broadcast %cst_33 : f32 to vector<5x128xf32>
    %55 = arith.select %41, %54, %53 : vector<5x128xi1>, vector<5x128xf32>
    %cst_34 = arith.constant dense<0.000000e+00> : vector<128xf32>
    %56 = vector.multi_reduction <add>, %55, %cst_34 [0] : vector<5x128xf32> to vector<128xf32>
    %57 = vector.shape_cast %56 : vector<128xf32> to vector<1x128xf32>
    %cst_35 = arith.constant 1.000000e+00 : f32
    %58 = vector.broadcast %cst_35 : f32 to vector<5x128xf32>
    %59 = arith.addf %58, %53 : vector<5x128xf32>
    %60 = vector.shape_cast %57 : vector<1x128xf32> to vector<1x128xf32>
    %61 = vector.broadcast %60 : vector<1x128xf32> to vector<5x128xf32>
    %62 = arith.select %41, %59, %61 : vector<5x128xi1>, vector<5x128xf32>
    %cst_36 = arith.constant 1.000000e+00 : f32
    %63 = vector.broadcast %cst_36 : f32 to vector<5x128xf32>
    %64 = arith.select %41, %63, %53 : vector<5x128xi1>, vector<5x128xf32>
    %65 = tpu.reciprocal %62 {approx = true} : vector<5x128xf32> -> vector<5x128xf32>
    %66 = arith.mulf %64, %65 : vector<5x128xf32>
    %c0_37 = arith.constant 0 : index
    %c0_38 = arith.constant 0 : index
    %67 = vector.load %arg12[%c0_37, %c0_38] : memref<5x128xf32, #tpu.memory_space<vmem>>, vector<5x128xf32>
    tpu.vector_store %arg12[%c0_37, %c0_38], %66 {strides = array<i32>} : memref<5x128xf32, #tpu.memory_space<vmem>>, vector<5x128xf32>,
    return
  }
  func.func @transform_0(%arg0: i32) -> (i32, i32) {
    %c0_i32 = arith.constant 0 : i32
    %c0_i32_0 = arith.constant 0 : i32
    return %arg0, %c0_i32 : i32, i32
  }
  func.func @transform_1(%arg0: i32) -> (i32, i32) {
    %c0_i32 = arith.constant 0 : i32
    %c0_i32_0 = arith.constant 0 : i32
    %c0_i32_1 = arith.constant 0 : i32
    return %c0_i32, %c0_i32_0 : i32, i32
  }
  func.func @transform_2(%arg0: i32) -> (i32, i32) {
    %c0_i32 = arith.constant 0 : i32
    %c0_i32_0 = arith.constant 0 : i32
    %c0_i32_1 = arith.constant 0 : i32
    return %c0_i32, %c0_i32_0 : i32, i32
  }
  func.func @transform_3(%arg0: i32) -> (i32, i32) {
    %c0_i32 = arith.constant 0 : i32
    %c0_i32_0 = arith.constant 0 : i32
    %c0_i32_1 = arith.constant 0 : i32
    return %c0_i32, %c0_i32_0 : i32, i32
  }
  func.func @transform_4(%arg0: i32) -> (i32, i32) {
    %c0_i32 = arith.constant 0 : i32
    %c0_i32_0 = arith.constant 0 : i32
    %c0_i32_1 = arith.constant 0 : i32
    return %c0_i32, %c0_i32_0 : i32, i32
  }
  func.func @transform_5(%arg0: i32) -> (i32, i32) {
    %c0_i32 = arith.constant 0 : i32
    %c0_i32_0 = arith.constant 0 : i32
    %c0_i32_1 = arith.constant 0 : i32
    return %c0_i32, %c0_i32_0 : i32, i32
  }
  func.func @transform_6(%arg0: i32) -> (i32, i32) {
    %c0_i32 = arith.constant 0 : i32
    %c0_i32_0 = arith.constant 0 : i32
    %c0_i32_1 = arith.constant 0 : i32
    return %c0_i32, %c0_i32_0 : i32, i32
  }
  func.func @transform_7(%arg0: i32) -> (i32, i32) {
    %c0_i32 = arith.constant 0 : i32
    %c0_i32_0 = arith.constant 0 : i32
    %c0_i32_1 = arith.constant 0 : i32
    return %c0_i32, %c0_i32_0 : i32, i32
  }
  func.func @transform_8(%arg0: i32) -> (i32, i32) {
    %c0_i32 = arith.constant 0 : i32
    %c0_i32_0 = arith.constant 0 : i32
    %c0_i32_1 = arith.constant 0 : i32
    return %c0_i32, %c0_i32_0 : i32, i32
  }
  func.func @transform_9(%arg0: i32) -> (i32, i32) {
    %c0_i32 = arith.constant 0 : i32
    %c0_i32_0 = arith.constant 0 : i32
    %c0_i32_1 = arith.constant 0 : i32
    return %c0_i32, %c0_i32_0 : i32, i32
  }
  func.func @transform_10(%arg0: i32) -> (i32, i32) {
    %c0_i32 = arith.constant 0 : i32
    %c0_i32_0 = arith.constant 0 : i32
    %c0_i32_1 = arith.constant 0 : i32
    return %c0_i32, %c0_i32_0 : i32, i32
  }
  func.func @transform_11(%arg0: i32) -> (i32, i32) {
    %c0_i32 = arith.constant 0 : i32
    %c0_i32_0 = arith.constant 0 : i32
    return %c0_i32, %arg0 : i32, i32
  }
}

</mosaic_0001>

<bundles_post_ra>
// kernel: tpu_custom_call.1
= control target key start
LH: loop header
LB: loop body
LE: loop exit
PB: predicated region body
PF: predicated region fallthrough
CT: control target
= control target key end

     0   :  { %vm140_vm0 = vcmask 80896   ;;  %s780_s0 = inlined_call_operand.vmem [shape: f32[128,10], index: 0, kind: input, shape index: {}]   ;;  %s781_s1 = inlined_call_operand.vmem [shape: bf16[64,10], index: 1, kind: input, shape index: {}]   ;;  %s782_s2 = inlined_call_operand.vmem [shape: f32[64,1], index: 2, kind: input, shape index: {}]   ;;  %s783_s3 = inlined_call_operand.vmem [shape: bf16[32,64], index: 3, kind: input, shape index: {}]   ;;  %s784_s4 = inlined_call_operand.vmem [shape: f32[32,1], index: 4, kind: input, shape index: {}]   ;;  %s785_s5 = inlined_call_operand.vmem [shape: bf16[16,32], index: 5, kind: input, shape index: {}]   ;;  %s786_s6 = inlined_call_operand.vmem [shape: f32[16,1], index: 6, kind: input, shape index: {}]   ;;  %s787_s7 = inlined_call_operand.vmem [shape: bf16[32,16], index: 7, kind: input, shape index: {}]   ;;  %s788_s8 = inlined_call_operand.vmem [shape: f32[32,1], index: 8, kind: input, shape index: {}]   ;;  %s789_s9 = inlined_call_operand.vmem [shape: bf16[5,32], index: 9, kind: input, shape index: {}]   ;;  %s790_s10 = inlined_call_operand.vmem [shape: f32[5,1], index: 10, kind: input, shape index: {}]   ;;  %s791_s11 = inlined_call_operand.hbm [shape: f32[5,128], index: 11, kind: output, shape index: {}]  }
   0x1   :  { %v54_v0 = vld [vmem:[%s780_s0 + $0x70] sm:$0xff]  ;;  %v55_v1 = vld [vmem:[%s780_s0 + $0x78] sm:$0xff]  ;;  %v52_v3 = vld [vmem:[%s780_s0 + $0x60] sm:$0xff] }
   0x2   :  { %v63_v2 = vpack.c.bf16 %v55_v1, %v54_v0  ;;  %v53_v4 = vld [vmem:[%s780_s0 + $0x68] sm:$0xff] }
   0x4   :  { %v175_v5 = vsel %vm140_vm0, %v63_v2, 0 }
   0x5   :  { %16 = vsyncpa [#allocation3], 0  ;;  %177 = vmatpush.bf16.xpose.msra.mxu0 %v175_v5  ;;  %v62_v6 = vpack.c.bf16 %v53_v4, %v52_v3  ;;  %v50_v8 = vld [vmem:[%s780_s0 + $0x50] sm:$0xff]  ;;  %v51_v9 = vld [vmem:[%s780_s0 + $0x58] sm:$0xff]  ;;  %v559_v20 = vmov 0   ;;  %vm256_vm1 = vcmask 523264  }
   0x6   :  { %v61_v10 = vpack.c.bf16 %v51_v9, %v50_v8  ;;  %v48_v12 = vld [vmem:[%s780_s0 + $0x40] sm:$0xff]  ;;  %v49_v13 = vld [vmem:[%s780_s0 + $0x48] sm:$0xff]  ;;  %v46_v16 = vld [vmem:[%s780_s0 + $0x30] sm:$0xff]  ;;  %526 = vset.pattern.permute.xlu0 %v559_v20  ;;  %527 = vset.pattern.permute.xlu1 %v559_v20  ;;  %vm307_vm2 = vcmask 261120   ;;  %vm366_vm3 = vcmask 130048   ;;  %vm425_vm5 = vcmask 1044480  }
   0x7   :  { %v172_v7 = vsel %vm140_vm0, %v62_v6, 0  ;;  %v60_v14 = vpack.c.bf16 %v49_v13, %v48_v12  ;;  %v47_v17 = vld [vmem:[%s780_s0 + $0x38] sm:$0xff]  ;;  %v78_v18 = vld [vmem:[%s782_s2 + $0x30] sm:$0xff]  ;;  %528 = vset.pattern.permute.xlu2 %v559_v20  ;;  %v44_v22 = vld [vmem:[%s780_s0 + $0x20] sm:$0xff]  ;;  %s460_s23 = sshll.u32 %s791_s11, 4  ;;  %s461_s23 = int_to_ptr.hbm [resolvable:$true] %s460_s23 }
   0x8   :  { %v169_v11 = vsel %vm140_vm0, %v61_v10, 0  ;;  %v59_v19 = vpack.c.bf16 %v47_v17, %v46_v16  ;;  %112 = vperm.xlu0 %526, %v78_v18   ;;  %v45_v23 = vld [vmem:[%s780_s0 + $0x28] sm:$0xff]  ;;  %v79_v24 = vld [vmem:[%s782_s2 + $0x38] sm:$0xff]  ;;  %v76_v25 = vld [vmem:[%s782_s2 + $0x20] sm:$0xff] }
   0x9   :  { %v166_v15 = vsel %vm140_vm0, %v60_v14, 0  ;;  %102 = vperm.xlu1 %527, %v76_v25   ;;  %v58_v26 = vpack.c.bf16 %v45_v23, %v44_v22  ;;  %v77_v28 = vld [vmem:[%s782_s2 + $0x28] sm:$0xff]  ;;  %v42_v29 = vld [vmem:[%s780_s0 + $0x10] sm:$0xff]  ;;  %v43_v30 = vld [vmem:[%s780_s0 + $0x18] sm:$0xff] }
   0xa   :  { %v163_v21 = vsel %vm140_vm0, %v59_v19, 0  ;;  %v72_v31 = vld [vmem:[%s782_s2] sm:$0xff]  ;;  %v57_v32 = vpack.c.bf16 %v43_v30, %v42_v29  ;;  %v41_v35 = vld [vmem:[%s780_s0 + $0x8] sm:$0xff]  ;;  %v225_v40 = vld [vmem:[%s784_s4 + $0x18] sm:$0xff] }
   0xb   :  { %v160_v27 = vsel %vm140_vm0, %v58_v26, 0  ;;  %v40_v34 = vld [vmem:[%s780_s0] sm:$0xff]  ;;  %v73_v36 = vld [vmem:[%s782_s2 + $0x8] sm:$0xff]  ;;  %v74_v44 = vld [vmem:[%s782_s2 + $0x10] sm:$0xff] }
   0xc   :  { %v157_v33 = vsel %vm140_vm0, %v57_v32, 0  ;;  %v56_v37 = vpack.c.bf16 %v41_v35, %v40_v34  ;;  %v515_v39 = vld [vmem:[%s781_s1] sm:$0xff]  ;;  %v516_v43 = vld [vmem:[%s781_s1 + $0x8] sm:$0xff]  ;;  %v335_v45 = vld [vmem:[%s788_s8 + $0x18] sm:$0xff]  ;;  %92 = vperm.xlu2 %528, %v74_v44  }
   0xd   :  { %178 = vmatpush.bf16.xpose.msra.mxu0 %v172_v7  ;;  %v222_v41 = vld [vmem:[%s784_s4] sm:$0xff]  ;;  %v291_v46 = vld [vmem:[%s786_s6 + $0x8] sm:$0xff]  ;;  %v75_v47 = vld [vmem:[%s782_s2 + $0x18] sm:$0xff] }
   0xe   :  { %v154_v38 = vsel %vm140_vm0, %v56_v37, 0  ;;  %v290_v42 = vld [vmem:[%s786_s6] sm:$0xff]  ;;  %v517_v50 = vld [vmem:[%s781_s1 + $0x10] sm:$0xff]  ;;  %v223_v52 = vld [vmem:[%s784_s4 + $0x8] sm:$0xff] }
   0xf   :  { %v399_v48 = vld [vmem:[%s790_s10] sm:$0x1f]  ;;  %v224_v51 = vld [vmem:[%s784_s4 + $0x10] sm:$0xff]  ;;  %v518_v53 = vld [vmem:[%s781_s1 + $0x18] sm:$0xff] }
  0x10   :  { %117 = vperm.xlu0 %526, %v79_v24   ;;  %v332_v49 = vld [vmem:[%s788_s8] sm:$0xff]  ;;  %v334_v54 = vld [vmem:[%s788_s8 + $0x10] sm:$0xff]  ;;  %v333_v55 = vld [vmem:[%s788_s8 + $0x8] sm:$0xff] }
  0x11   :  { %107 = vperm.xlu1 %527, %v77_v28   ;;  %v519_v28 = vld [vmem:[%s783_s3] sm:$0xff]  ;;  %v520_v29 = vld [vmem:[%s783_s3 + $0x8] sm:$0xff] }
  0x14   :  { %97 = vperm.xlu2 %528, %v75_v47  }
  0x15   :  { %179 = vmatpush.bf16.xpose.msra.mxu0 %v169_v11 }
  0x18   :  { %82 = vperm.xlu0 %526, %v72_v31  }
  0x19   :  { %87 = vperm.xlu1 %527, %v73_v36  }
  0x1c   :  { %238 = vperm.xlu2 %528, %v224_v51  }
  0x1d   :  { %180 = vmatpush.bf16.xpose.msra.mxu0 %v166_v15 }
  0x20   :  { %243 = vperm.xlu0 %526, %v225_v40  }
  0x21   :  { %228 = vperm.xlu1 %527, %v222_v41  }
  0x24   :  { %233 = vperm.xlu2 %528, %v223_v52  }
  0x25   :  { %181 = vmatpush.bf16.xpose.msra.mxu0 %v163_v21 }
  0x28   :  { %294 = vperm.xlu0 %526, %v290_v42  }
  0x29   :  { %299 = vperm.xlu1 %527, %v291_v46  }
  0x2c   :  { %348 = vperm.xlu2 %528, %v334_v54  }
  0x2d   :  { %182 = vmatpush.bf16.xpose.msra.mxu0 %v160_v27 }
  0x30   :  { %353 = vperm.xlu0 %526, %v335_v45  }
  0x31   :  { %338 = vperm.xlu1 %527, %v332_v49  }
  0x34   :  { %343 = vperm.xlu2 %528, %v333_v55  }
  0x35   :  { %183 = vmatpush.bf16.xpose.msra.mxu0 %v157_v33 }
  0x38   :  { %402 = vperm.xlu0 %526, %v399_v48   ;;  %v521_v48 = vld [vmem:[%s785_s5] sm:$0xff] }
  0x3d   :  { %184 = vmatpush.bf16.xpose.msra.mxu0 %v154_v38 }
  0x44   :  { %485 = vmatmul.msk.bf16.vlgmr.msra.gmra.mxu0 %vm140_vm0, %v515_v39 }
  0x54   :  { %486 = vmatmul.msk.bf16.gmra.mxu0 %vm140_vm0, %v516_v43 }
  0x64   :  { %487 = vmatmul.msk.bf16.gmra.mxu0 %vm140_vm0, %v517_v50 }
  0x66   :  { %v93_v0 = vpop.permute.xlu2 %92 }
  0x6e   :  { %v98_v8 = vpop.permute.xlu2 %97 }
  0x74   :  { %488 = vmatmul.msk.bf16.gmra.mxu0 %vm140_vm0, %v518_v53 }
  0x76   :  { %v239_v32 = vpop.permute.xlu2 %238 }
  0x7a   :  { %v113_v63 = vpop.permute.xlu0 %112 }
  0x7b   :  { %v103_v62 = vpop.permute.xlu1 %102 }
  0x7e   :  { %v234_v36 = vpop.permute.xlu2 %233 }
  0x82   :  { %v118_v3 = vpop.permute.xlu0 %117 }
  0x83   :  { %v108_v2 = vpop.permute.xlu1 %107 }
  0x8a   :  { %v83_v18 = vpop.permute.xlu0 %82 }
  0x8b   :  { %v88_v15 = vpop.permute.xlu1 %87 }
  0x92   :  { %v244_v34 = vpop.permute.xlu0 %243 }
  0x93   :  { %v229_v40 = vpop.permute.xlu1 %228 }
  0x9a   :  { %v295_v50 = vpop.permute.xlu0 %294 }
  0x9b   :  { %v300_v52 = vpop.permute.xlu1 %299 }
  0xc1   :  { %v186_v56 = vpop.f32.mrf.mxu0 }
  0xc2   :  { %v187_v22 = vadd.f32 %v186_v56, %v83_v18 }
  0xc4   :  { %v206_v26 = vmax.f32 %v187_v22, 0.0 }
  0xc9   :  { %v188_v57 = vpop.f32.mrf.mxu0 }
  0xca   :  { %v189_v19 = vadd.f32 %v188_v57, %v88_v15  ;;  %v421_v15 = vlaneseq }
  0xcc   :  { %v207_v24 = vmax.f32 %v189_v19, 0.0 }
  0xce   :  { %v214_v27 = vpack.c.bf16 %v207_v24, %v206_v26 }
  0xd1   :  { %v191_v58 = vpop.f32.mrf.mxu0 }
  0xd2   :  { %v192_v16 = vadd.f32 %v191_v58, %v93_v0  ;;  %v522_v58 = vld [vmem:[%s787_s7] sm:$0xff]  ;;  %v354_v0 = vpop.permute.xlu0 %353 }
  0xd4   :  { %v208_v23 = vmax.f32 %v192_v16, 0.0  ;;  %v422_v16 = vshrl.u32 %v421_v15, 7 }
  0xd6   :  { %vm423_vm4 = vcmp.lt.s32.totalorder %v422_v16, 2 }
  0xd9   :  { %v193_v59 = vpop.f32.mrf.mxu0 }
  0xda   :  { %v194_v12 = vadd.f32 %v193_v59, %v98_v8  ;;  %v523_v59 = vld [vmem:[%s787_s7 + $0x8] sm:$0xff] }
  0xdc   :  { %v209_v20 = vmax.f32 %v194_v12, 0.0 }
  0xde   :  { %v215_v25 = vpack.c.bf16 %v209_v20, %v208_v23 }
  0xe1   :  { %v196_v60 = vpop.f32.mrf.mxu0 }
  0xe2   :  { %v197_v9 = vadd.f32 %v196_v60, %v103_v62  ;;  %v349_v62 = vpop.permute.xlu2 %348 }
  0xe4   :  { %v210_v17 = vmax.f32 %v197_v9, 0.0 }
  0xe9   :  { %v198_v61 = vpop.f32.mrf.mxu0 }
  0xea   :  { %v199_v6 = vadd.f32 %v198_v61, %v108_v2  ;;  %v344_v2 = vpop.permute.xlu2 %343 }
  0xec   :  { %v211_v13 = vmax.f32 %v199_v6, 0.0  ;;  %v339_v6 = vpop.permute.xlu1 %338 }
  0xee   :  { %v216_v21 = vpack.c.bf16 %v211_v13, %v210_v17  ;;  %v403_v17 = vpop.permute.xlu0 %402 }
  0xf1   :  { %v201_v1 = vpop.f32.mrf.mxu0 }
  0xf2   :  { %v202_v4 = vadd.f32 %v201_v1, %v113_v63 }
  0xf4   :  { %v212_v10 = vmax.f32 %v202_v4, 0.0 }
  0xf9   :  { %v203_v5 = vpop.f32.mrf.mxu0 }
  0xfa   :  { %v204_v7 = vadd.f32 %v203_v5, %v118_v3 }
  0xfc   :  { %v213_v11 = vmax.f32 %v204_v7, 0.0 }
  0xfe   :  { %v217_v14 = vpack.c.bf16 %v213_v11, %v212_v10 }
 0x100   :  { %267 = vmatpush.bf16.msra.mxu1 %v217_v14  ;;  %v398_v14 = vld [vmem:[%s789_s9] sm:$0x7]  ;;  %s560_s9 = smov [#allocation2]  }
 0x101   :  { %s458_s20 = sshll.u32 %s560_s9, 4  ;;  %s459_s20 = int_to_ptr.vmem [resolvable:$true] %s458_s20 }
 0x104   :  { %268 = vmatpush.bf16.msra.mxu1 %v216_v21 }
 0x108   :  { %269 = vmatpush.bf16.msra.mxu1 %v215_v25 }
 0x10c   :  { %270 = vmatpush.bf16.msra.mxu1 %v214_v27 }
 0x10f   :  { %497 = vmatmul.msk.bf16.vlgmr.msra.gmra.mxu1 %vm256_vm1, %v519_v28 }
 0x11f   :  { %498 = vmatmul.msk.bf16.gmra.mxu1 %vm256_vm1, %v520_v29 }
 0x18c   :  { %v272_v30 = vpop.f32.mrf.mxu1 }
 0x18d   :  { %v273_v41 = vadd.f32 %v272_v30, %v229_v40 }
 0x18f   :  { %v282_v46 = vmax.f32 %v273_v41, 0.0 }
 0x194   :  { %v274_v31 = vpop.f32.mrf.mxu1 }
 0x195   :  { %v275_v38 = vadd.f32 %v274_v31, %v234_v36 }
 0x197   :  { %v283_v44 = vmax.f32 %v275_v38, 0.0 }
 0x199   :  { %v286_v47 = vpack.c.bf16 %v283_v44, %v282_v46 }
 0x19c   :  { %v277_v33 = vpop.f32.mrf.mxu1 }
 0x19d   :  { %v278_v35 = vadd.f32 %v277_v33, %v239_v32 }
 0x19f   :  { %v284_v42 = vmax.f32 %v278_v35, 0.0 }
 0x1a4   :  { %v279_v37 = vpop.f32.mrf.mxu1 }
 0x1a5   :  { %v280_v39 = vadd.f32 %v279_v37, %v244_v34 }
 0x1a7   :  { %v285_v43 = vmax.f32 %v280_v39, 0.0 }
 0x1a9   :  { %v287_v45 = vpack.c.bf16 %v285_v43, %v284_v42 }
 0x1ab   :  { %317 = vmatpush.bf16.msra.mxu2 %v287_v45 }
 0x1af   :  { %318 = vmatpush.bf16.msra.mxu2 %v286_v47 }
 0x1b2   :  { %503 = vmatmul.msk.bf16.vlgmr.msra.gmra.mxu2 %vm307_vm2, %v521_v48 }
 0x235   :  { %v320_v49 = vpop.f32.mrf.mxu2 }
 0x236   :  { %v321_v51 = vadd.f32 %v320_v49, %v295_v50 }
 0x238   :  { %v325_v55 = vmax.f32 %v321_v51, 0.0 }
 0x23d   :  { %v322_v53 = vpop.f32.mrf.mxu2 }
 0x23e   :  { %v323_v54 = vadd.f32 %v322_v53, %v300_v52 }
 0x240   :  { %v326_v56 = vmax.f32 %v323_v54, 0.0 }
 0x242   :  { %v327_v57 = vpack.c.bf16 %v326_v56, %v325_v55 }
 0x244   :  { %380 = vmatpush.bf16.msra.mxu3 %v327_v57 }
 0x247   :  { %512 = vmatmul.msk.bf16.vlgmr.msra.gmra.mxu3 %vm366_vm3, %v522_v58 }
 0x257   :  { %513 = vmatmul.msk.bf16.gmra.mxu3 %vm366_vm3, %v523_v59 }
 0x2ca   :  { %v382_v60 = vpop.f32.mrf.mxu3 }
 0x2cb   :  { %v383_v7 = vadd.f32 %v382_v60, %v339_v6 }
 0x2cd   :  { %v392_v12 = vmax.f32 %v383_v7, 0.0 }
 0x2d2   :  { %v384_v61 = vpop.f32.mrf.mxu3 }
 0x2d3   :  { %v385_v4 = vadd.f32 %v384_v61, %v344_v2 }
 0x2d5   :  { %v393_v10 = vmax.f32 %v385_v4, 0.0 }
 0x2d7   :  { %v396_v13 = vpack.c.bf16 %v393_v10, %v392_v12 }
 0x2da   :  { %v387_v63 = vpop.f32.mrf.mxu3 }
 0x2db   :  { %v388_v1 = vadd.f32 %v387_v63, %v349_v62 }
 0x2dd   :  { %v394_v8 = vmax.f32 %v388_v1, 0.0 }
 0x2e2   :  { %v389_v3 = vpop.f32.mrf.mxu3 }
 0x2e3   :  { %v390_v5 = vadd.f32 %v389_v3, %v354_v0 }
 0x2e5   :  { %v395_v9 = vmax.f32 %v390_v5, 0.0 }
 0x2e7   :  { %v397_v11 = vpack.c.bf16 %v395_v9, %v394_v8 }
 0x2e9   :  { %414 = vmatpush.bf16.msrb.mxu2 %v397_v11 }
 0x2ed   :  { %415 = vmatpush.bf16.msrb.mxu2 %v396_v13 }
 0x2f0   :  { %514 = vmatmul.msk.bf16.vlgmr.msrb.gmra.mxu2 %vm307_vm2, %v398_v14 }
 0x373   :  { %v417_v18 = vpop.f32.mrf.mxu2 }
 0x374   :  { %v418_v19 = vadd.f32 %v417_v18, %v403_v17 }
 0x376   :  { %v424_v20 = vsel %vm423_vm4, -inf, %v418_v19  ;;  %v433_v29 = vsub.f32 0.0, %v418_v19 }
 0x377   :  { %v426_v21 = vsel %vm425_vm5, %v424_v20, -inf }
 0x378   :  { %v427_v22 = vrot.slane %v426_v21, 4 }
 0x37a   :  { %v428_v23 = vmax.f32 %v426_v21, %v427_v22 }
 0x37b   :  { %v419_v24 = vpop.f32.mrf.mxu2 }
 0x37c   :  { %v429_v25 = vrot.slane %v428_v23, 2 }
 0x37e   :  { %v430_v26 = vmax.f32 %v428_v23, %v429_v25 }
 0x380   :  { %v431_v27 = vrot.slane %v430_v26, 1 }
 0x382   :  { %v432_v28 = vmax.f32 %v430_v26, %v431_v27 }
 0x384   :  { %v434_v30 = vsub.f32 %v418_v19, %v432_v28 }
 0x386   :  { %v435_v31 = vsel %vm423_vm4, %v433_v29, %v434_v30 }
 0x387   :  { %v436_v32 = vmin.f32 %v435_v31, 80.0 }
 0x389   :  { %v437_v33 = vmul.f32 1.442695, %v436_v32 }
 0x38b   :  { %529 = vpow2.f32 %v437_v33 }
 0x391   :  { %v530_v34 = vpop.eup %529 }
 0x392   :  { %v439_v35 = vsel %vm423_vm4, 0.0, %v530_v34  ;;  %v447_v43 = vadd.f32 1.0, %v530_v34  ;;  %v449_v46 = vsel %vm423_vm4, 1.0, %v530_v34 }
 0x393   :  { %v440_v36 = vsel %vm425_vm5, %v439_v35, 0.0 }
 0x394   :  { %v441_v37 = vrot.slane %v440_v36, 4 }
 0x396   :  { %v442_v38 = vadd.f32 %v441_v37, %v440_v36 }
 0x398   :  { %v443_v39 = vrot.slane %v442_v38, 2 }
 0x39a   :  { %v444_v40 = vadd.f32 %v443_v39, %v442_v38 }
 0x39c   :  { %v445_v41 = vrot.slane %v444_v40, 1 }
 0x39e   :  { %v446_v42 = vadd.f32 %v445_v41, %v444_v40 }
 0x3a0   :  { %v448_v44 = vsel %vm423_vm4, %v447_v43, %v446_v42 }
 0x3a1   :  { %531 = vrcp.f32 %v448_v44 }
 0x3a7   :  { %v532_v45 = vpop.eup %531 }
 0x3a8   :  { %v451_v47 = vmul.f32 %v532_v45, %v449_v46 }
 0x3aa   :  { %452 = vst [vmem:[#allocation2] sm:$0x1f] %v451_v47 }
 0x3ab   :  { %463 = dma.vmem_to_hbm [thread:$0]  %s459_s20, 128, %s461_s23, [#allocation3]  }
 0x3ac   :  { %557 = dma.done.wait [#allocation3], 128  }
 0x3ad   :  { %558 = vsyncadd [#allocation3], 4294967168 }
 0x3ae   :  { %468 = vsyncpa [#allocation3], 1 }

</bundles_post_ra>
